<compile_context>
chip_gen: v7x
topology: tpu7x:2x2x1
jax: 0.10.0
libtpu: 0.0.40
codegen_flags: <defaults>
</compile_context>

<pallas_src>
import functools

import jax
import jax.numpy as jnp
from jax.experimental import pallas as pl
from jax.experimental.pallas import tpu as pltpu


def _round_up(n: int, m: int) -> int:
    return ((n + m - 1) // m) * m


def fused_affine_kernel(x_ref, w_ref, b_ref, o_ref):
    """One batch tile of y = x @ w_fused + b_fused.

    x_ref: (d_in, TB) VMEM  -- batch on the LANE axis (lane-dense DMA/compute)
    w_ref: (d_in,)    SMEM  -- fused weight (W2 @ W1), 10 scalars
    b_ref: (1,)       SMEM  -- fused scalar bias
    o_ref: (1, TB)    VMEM  -- lane-dense output row
    """
    d_in = x_ref.shape[0]
    # Hoist the bias broadcast out of the MAC chain.
    acc = jnp.full(o_ref.shape, b_ref[0], dtype=jnp.float32)
    # 10-term VPU broadcast-MAC (no MXU push for an M=1, K=10 "matmul").
    for k in range(d_in):  # d_in is static -> fully unrolled
        acc += x_ref[k:k + 1, :] * w_ref[k]
    o_ref[...] = acc.astype(o_ref.dtype)


def _pick_batch_tile(b_padded_128: int) -> int:
    """Pick the batch-tile (lane) width.

    Lane-dense x blocks cost 16 (padded sublanes) * tb * 4 B per buffer, so
    tb = 32768 is ~2 MiB/buffer (~6 MiB total with double-buffered x + out) --
    comfortably inside the scoped-VMEM defaults of v5e (16 MiB), v6e (32 MiB)
    and v7x (32 MiB of 64 MiB physical).  cdiv-splitting keeps >= 2 grid steps
    whenever the batch is large, so v7x can shard steps across both TCs.
    """
    TB_MAX = 32768
    if b_padded_128 <= TB_MAX:
        return b_padded_128  # small batch: single step
    n_steps = pl.cdiv(b_padded_128, TB_MAX)
    return _round_up(pl.cdiv(b_padded_128, n_steps), 128)


@functools.partial(jax.jit, static_argnames=("tb",))
def simple_model_forward(x, w1, b1, w2, b2, *, tb=None):
    """SimpleModel forward: Linear(10,20) -> Linear(20,1), no activation.

    Weights use the PyTorch nn.Linear layout: w1 (20,10), b1 (20,),
    w2 (1,20), b2 (1,).  Returns (B, 1), matching the PyTorch module.
    """
    B, d_in = x.shape

    # No nonlinearity between the layers -> fold them into a single affine map
    # (computed in f32; w1/b1 never reach the kernel).
    w_fused = (w2 @ w1).reshape(d_in).astype(jnp.float32)      # (10,)
    b_fused = (w2 @ b1 + b2).reshape(1).astype(jnp.float32)    # (1,)

    b_128 = _round_up(max(B, 1), 128)
    if tb is None:
        tb = _pick_batch_tile(b_128)
    else:
        tb = max(128, _round_up(tb, 128))
    b_pad = _round_up(b_128, tb)

    # Lane-dense layout: batch on the last (lane) axis.
    xt = jnp.transpose(x.astype(jnp.float32))                  # (10, B)
    if b_pad != B:
        xt = jnp.pad(xt, ((0, 0), (0, b_pad - B)))

    out = pl.pallas_call(
        fused_affine_kernel,
        out_shape=jax.ShapeDtypeStruct((1, b_pad), jnp.float32),
        grid=(b_pad // tb,),
        in_specs=[
            # x^T: one (d_in, tb) lane-dense batch tile per grid step.
            pl.BlockSpec((d_in, tb), lambda i: (0, i)),
            # fused weights + bias live in SMEM (scalars for the VPU MAC).
            pl.BlockSpec(memory_space=pltpu.MemorySpace.SMEM),
            pl.BlockSpec(memory_space=pltpu.MemorySpace.SMEM),
        ],
        # Lane-dense output: one (1, tb) row per step, batch on lanes.
        out_specs=pl.BlockSpec((1, tb), lambda i: (0, i)),
        compiler_params=pltpu.CompilerParams(
            dimension_semantics=("parallel",),
        ),
    )(xt, w_fused, b_fused)

    # Slice the padding off BEFORE reshaping to (B, 1) so the epilogue is a
    # cheap slice + small reshape instead of a full-width relayout copy.
    return out[0, :B].reshape(B, 1)


if __name__ == "__main__":
    key = jax.random.PRNGKey(0)
    k_x, k_w1, k_b1, k_w2, k_b2 = jax.random.split(key, 5)

    D_IN, D_HID, D_OUT = 10, 20, 1

    # Parameters in PyTorch nn.Linear layout.
    w1 = jax.random.uniform(k_w1, (D_HID, D_IN), jnp.float32, -0.3, 0.3)
    b1 = jax.random.uniform(k_b1, (D_HID,), jnp.float32, -0.3, 0.3)
    w2 = jax.random.uniform(k_w2, (D_OUT, D_HID), jnp.float32, -0.2, 0.2)
    b2 = jax.random.uniform(k_b2, (D_OUT,), jnp.float32, -0.2, 0.2)

    # Small batch (single padded step) and a multi-step grid (tb=128 -> 4 steps).
    for B, tb in ((8, None), (512, 128)):
        x = jax.random.normal(jax.random.fold_in(k_x, B), (B, D_IN), jnp.float32)

        out = simple_model_forward(x, w1, b1, w2, b2, tb=tb)
        out = jax.block_until_ready(out)

        # Pure-JAX reference (unfused two-layer form, PyTorch semantics).
        ref = (x @ w1.T + b1) @ w2.T + b2
        assert out.shape == (B, D_OUT), (out.shape, (B, D_OUT))
        assert jnp.allclose(out, ref, atol=1e-4, rtol=1e-4), f"mismatch at B={B}"

    print("KERNEL_OK")
</pallas_src>

<mosaic_0001>
module attributes {stable_mosaic.version = 11 : i64} {
  func.func @fused_affine_kernel(%arg0: i32, %arg1: memref<10x128xf32, #tpu.memory_space<vmem>>, %arg2: memref<10xf32, #tpu.memory_space<smem>>, %arg3: memref<1xf32, #tpu.memory_space<smem>>, %arg4: memref<1x128xf32, #tpu.memory_space<vmem>>) attributes {dimension_semantics = [#tpu.dimension_semantics<parallel>], iteration_bounds = array<i64: 1>, scalar_prefetch = 0 : i64, scratch_operands = 0 : i64, tpu.core_type = #tpu.core_type<tc>, window_params = [{transform_indices = @transform_0, window_bounds = array<i64: 10, 128>}, {transform_indices = @transform_1, window_bounds = array<i64: 10>}, {transform_indices = @transform_2, window_bounds = array<i64: 1>}, {transform_indices = @transform_3, window_bounds = array<i64: 1, 128>}]} {
    %c0 = arith.constant 0 : index
    %0 = memref.load %arg3[%c0] : memref<1xf32, #tpu.memory_space<smem>>
    %1 = vector.broadcast %0 : f32 to vector<1x128xf32>
    %c0_0 = arith.constant 0 : index
    %c0_1 = arith.constant 0 : index
    %2 = vector.load %arg1[%c0_0, %c0_1] : memref<10x128xf32, #tpu.memory_space<vmem>>, vector<1x128xf32>
    %c0_2 = arith.constant 0 : index
    %3 = memref.load %arg2[%c0_2] : memref<10xf32, #tpu.memory_space<smem>>
    %4 = vector.broadcast %3 : f32 to vector<1x128xf32>
    %5 = arith.mulf %2, %4 : vector<1x128xf32>
    %6 = arith.addf %1, %5 : vector<1x128xf32>
    %c1 = arith.constant 1 : index
    %c0_3 = arith.constant 0 : index
    %7 = vector.load %arg1[%c1, %c0_3] : memref<10x128xf32, #tpu.memory_space<vmem>>, vector<1x128xf32>
    %c1_4 = arith.constant 1 : index
    %8 = memref.load %arg2[%c1_4] : memref<10xf32, #tpu.memory_space<smem>>
    %9 = vector.broadcast %8 : f32 to vector<1x128xf32>
    %10 = arith.mulf %7, %9 : vector<1x128xf32>
    %11 = arith.addf %6, %10 : vector<1x128xf32>
    %c2 = arith.constant 2 : index
    %c0_5 = arith.constant 0 : index
    %12 = vector.load %arg1[%c2, %c0_5] : memref<10x128xf32, #tpu.memory_space<vmem>>, vector<1x128xf32>
    %c2_6 = arith.constant 2 : index
    %13 = memref.load %arg2[%c2_6] : memref<10xf32, #tpu.memory_space<smem>>
    %14 = vector.broadcast %13 : f32 to vector<1x128xf32>
    %15 = arith.mulf %12, %14 : vector<1x128xf32>
    %16 = arith.addf %11, %15 : vector<1x128xf32>
    %c3 = arith.constant 3 : index
    %c0_7 = arith.constant 0 : index
    %17 = vector.load %arg1[%c3, %c0_7] : memref<10x128xf32, #tpu.memory_space<vmem>>, vector<1x128xf32>
    %c3_8 = arith.constant 3 : index
    %18 = memref.load %arg2[%c3_8] : memref<10xf32, #tpu.memory_space<smem>>
    %19 = vector.broadcast %18 : f32 to vector<1x128xf32>
    %20 = arith.mulf %17, %19 : vector<1x128xf32>
    %21 = arith.addf %16, %20 : vector<1x128xf32>
    %c4 = arith.constant 4 : index
    %c0_9 = arith.constant 0 : index
    %22 = vector.load %arg1[%c4, %c0_9] : memref<10x128xf32, #tpu.memory_space<vmem>>, vector<1x128xf32>
    %c4_10 = arith.constant 4 : index
    %23 = memref.load %arg2[%c4_10] : memref<10xf32, #tpu.memory_space<smem>>
    %24 = vector.broadcast %23 : f32 to vector<1x128xf32>
    %25 = arith.mulf %22, %24 : vector<1x128xf32>
    %26 = arith.addf %21, %25 : vector<1x128xf32>
    %c5 = arith.constant 5 : index
    %c0_11 = arith.constant 0 : index
    %27 = vector.load %arg1[%c5, %c0_11] : memref<10x128xf32, #tpu.memory_space<vmem>>, vector<1x128xf32>
    %c5_12 = arith.constant 5 : index
    %28 = memref.load %arg2[%c5_12] : memref<10xf32, #tpu.memory_space<smem>>
    %29 = vector.broadcast %28 : f32 to vector<1x128xf32>
    %30 = arith.mulf %27, %29 : vector<1x128xf32>
    %31 = arith.addf %26, %30 : vector<1x128xf32>
    %c6 = arith.constant 6 : index
    %c0_13 = arith.constant 0 : index
    %32 = vector.load %arg1[%c6, %c0_13] : memref<10x128xf32, #tpu.memory_space<vmem>>, vector<1x128xf32>
    %c6_14 = arith.constant 6 : index
    %33 = memref.load %arg2[%c6_14] : memref<10xf32, #tpu.memory_space<smem>>
    %34 = vector.broadcast %33 : f32 to vector<1x128xf32>
    %35 = arith.mulf %32, %34 : vector<1x128xf32>
    %36 = arith.addf %31, %35 : vector<1x128xf32>
    %c7 = arith.constant 7 : index
    %c0_15 = arith.constant 0 : index
    %37 = vector.load %arg1[%c7, %c0_15] : memref<10x128xf32, #tpu.memory_space<vmem>>, vector<1x128xf32>
    %c7_16 = arith.constant 7 : index
    %38 = memref.load %arg2[%c7_16] : memref<10xf32, #tpu.memory_space<smem>>
    %39 = vector.broadcast %38 : f32 to vector<1x128xf32>
    %40 = arith.mulf %37, %39 : vector<1x128xf32>
    %41 = arith.addf %36, %40 : vector<1x128xf32>
    %c8 = arith.constant 8 : index
    %c0_17 = arith.constant 0 : index
    %42 = vector.load %arg1[%c8, %c0_17] : memref<10x128xf32, #tpu.memory_space<vmem>>, vector<1x128xf32>
    %c8_18 = arith.constant 8 : index
    %43 = memref.load %arg2[%c8_18] : memref<10xf32, #tpu.memory_space<smem>>
    %44 = vector.broadcast %43 : f32 to vector<1x128xf32>
    %45 = arith.mulf %42, %44 : vector<1x128xf32>
    %46 = arith.addf %41, %45 : vector<1x128xf32>
    %c9 = arith.constant 9 : index
    %c0_19 = arith.constant 0 : index
    %47 = vector.load %arg1[%c9, %c0_19] : memref<10x128xf32, #tpu.memory_space<vmem>>, vector<1x128xf32>
    %c9_20 = arith.constant 9 : index
    %48 = memref.load %arg2[%c9_20] : memref<10xf32, #tpu.memory_space<smem>>
    %49 = vector.broadcast %48 : f32 to vector<1x128xf32>
    %50 = arith.mulf %47, %49 : vector<1x128xf32>
    %51 = arith.addf %46, %50 : vector<1x128xf32>
    %c0_21 = arith.constant 0 : index
    %c0_22 = arith.constant 0 : index
    %52 = vector.load %arg4[%c0_21, %c0_22] : memref<1x128xf32, #tpu.memory_space<vmem>>, vector<1x128xf32>
    tpu.vector_store %arg4[%c0_21, %c0_22], %51 {strides = array<i32>} : memref<1x128xf32, #tpu.memory_space<vmem>>, vector<1x128xf32>,
    return
  }
  func.func @transform_0(%arg0: i32) -> (i32, i32) {
    %c0_i32 = arith.constant 0 : i32
    %c0_i32_0 = arith.constant 0 : i32
    return %c0_i32, %arg0 : i32, i32
  }
  func.func @transform_1(%arg0: i32) -> i32 {
    %c0_i32 = arith.constant 0 : i32
    %c0_i32_0 = arith.constant 0 : i32
    return %c0_i32 : i32
  }
  func.func @transform_2(%arg0: i32) -> i32 {
    %c0_i32 = arith.constant 0 : i32
    %c0_i32_0 = arith.constant 0 : i32
    return %c0_i32 : i32
  }
  func.func @transform_3(%arg0: i32) -> (i32, i32) {
    %c0_i32 = arith.constant 0 : i32
    %c0_i32_0 = arith.constant 0 : i32
    return %c0_i32, %arg0 : i32, i32
  }
}

</mosaic_0001>

<bundles_post_ra>
// kernel: simple_model_forward.1
= control target key start
LH: loop header
LB: loop body
LE: loop exit
PB: predicated region body
PF: predicated region fallthrough
CT: control target
= control target key end

     0   :  { %9 = vsyncpa [#allocation4], 0  ;;  %s170_s0 = inlined_call_operand.vmem [shape: f32[10,128], index: 0, kind: input, shape index: {}]   ;;  %s171_s1 = inlined_call_operand.vmem [shape: f32[10], index: 1, kind: input, shape index: {}]   ;;  %s172_s2 = inlined_call_operand.<no memory space> [shape: f32[1], index: 2, kind: input, shape index: {}]   ;;  %s173_s3 = inlined_call_operand.vmem [shape: f32[1,128], index: 3, kind: output, shape index: {}]  }
   0x1   :  { %s18_s14 = sshll.u32 %s171_s1, 4  ;;  %s19_s14 = int_to_ptr.vmem [resolvable:$true] %s18_s14 }
   0x2   :  { %s96_s15 = scalar_lea.vmem %s19_s14, 16  ;;  %p101_p1 = scmp.lt.s32.totalorder %s19_s14, %s19_s14 }
   0x3   :  { %p97_p0 = scmp.ne.s32.totalorder %s19_s14, %s96_s15  ;;  %p102_p2 = scmp.lt.s32.totalorder %s96_s15, %s96_s15 }
   0x5   :  { %p103_p3 = por %p102_p2, %p101_p1 }
   0x7   :  { %p104_p4 = pnand %p103_p3, %p97_p0 }
   0x9   :  { %107 = shalt.err (!%p104_p4)
}
   0xa   :  { %s110_s16 = smov [#allocation3]  }
   0xb   :  { %21 = dma.vmem_to_smem %s19_s14, 16, %s110_s16, [#allocation4]  }
   0xc   :  { %108 = dma.done.wait [#allocation4], 16  }
   0xd   :  { %109 = vsyncadd [#allocation4], 4294967280 }
   0xe   :  { %27 = sfence }
   0xf   :  { %s31_s17 = sld [smem:[#allocation3]]  ;;  %s86_s18 = sld [smem:[#allocation3 + $0x1]]  ;;  %v30_v0 = vld [vmem:[%s170_s0] sm:$0x1]  ;;  %v35_v1 = vld [vmem:[%s170_s0 + $0x1] sm:$0x1]  ;;  %v29_v2 = vstv %s172_s2 }
  0x10   :  { %s87_s19 = sld [smem:[#allocation3 + $0x2]]  ;;  %s88_s20 = sld [smem:[#allocation3 + $0x3]]  ;;  %v40_v4 = vld [vmem:[%s170_s0 + $0x2] sm:$0x1]  ;;  %v45_v9 = vld [vmem:[%s170_s0 + $0x3] sm:$0x1] }
  0x11   :  { %s89_s21 = sld [smem:[#allocation3 + $0x4]]  ;;  %s90_s23 = sld [smem:[#allocation3 + $0x5]]  ;;  %v50_v13 = vld [vmem:[%s170_s0 + $0x4] sm:$0x1]  ;;  %v55_v17 = vld [vmem:[%s170_s0 + $0x5] sm:$0x1] }
  0x12   :  { %s91_s30 = sld [smem:[#allocation3 + $0x6]]  ;;  %s92_s6 = sld [smem:[#allocation3 + $0x7]]  ;;  %v60_v21 = vld [vmem:[%s170_s0 + $0x6] sm:$0x1]  ;;  %v65_v25 = vld [vmem:[%s170_s0 + $0x7] sm:$0x1] }
  0x13   :  { %s93_s8 = sld [smem:[#allocation3 + $0x8]]  ;;  %s94_s11 = sld [smem:[#allocation3 + $0x9]]  ;;  %v70_v29 = vld [vmem:[%s170_s0 + $0x8] sm:$0x1]  ;;  %v75_v33 = vld [vmem:[%s170_s0 + $0x9] sm:$0x1] }
  0x15   :  { %v32_v3 = vstv %s31_s17  ;;  %v37_v6 = vstv %s86_s18 }
  0x16   :  { %v33_v5 = vmul.f32 %v32_v3, %v30_v0  ;;  %v42_v7 = vstv %s87_s19  ;;  %v38_v8 = vmul.f32 %v37_v6, %v35_v1  ;;  %v47_v10 = vstv %s88_s20 }
  0x17   :  { %v43_v12 = vmul.f32 %v42_v7, %v40_v4  ;;  %v52_v14 = vstv %s89_s21  ;;  %v48_v16 = vmul.f32 %v47_v10, %v45_v9  ;;  %v57_v18 = vstv %s90_s23 }
  0x18   :  { %v34_v11 = vadd.f32 %v33_v5, %v29_v2  ;;  %v53_v20 = vmul.f32 %v52_v14, %v50_v13  ;;  %v62_v22 = vstv %s91_s30  ;;  %v58_v24 = vmul.f32 %v57_v18, %v55_v17 }
  0x19   :  { %v67_v26 = vstv %s92_s6  ;;  %v63_v28 = vmul.f32 %v62_v22, %v60_v21  ;;  %v72_v30 = vstv %s93_s8  ;;  %v77_v34 = vstv %s94_s11 }
  0x1a   :  { %v39_v15 = vadd.f32 %v38_v8, %v34_v11  ;;  %v68_v32 = vmul.f32 %v67_v26, %v65_v25  ;;  %v73_v36 = vmul.f32 %v72_v30, %v70_v29  ;;  %v78_v38 = vmul.f32 %v77_v34, %v75_v33 }
  0x1c   :  { %v44_v19 = vadd.f32 %v43_v12, %v39_v15 }
  0x1e   :  { %v49_v23 = vadd.f32 %v48_v16, %v44_v19 }
  0x20   :  { %v54_v27 = vadd.f32 %v53_v20, %v49_v23 }
  0x22   :  { %v59_v31 = vadd.f32 %v58_v24, %v54_v27 }
  0x24   :  { %v64_v35 = vadd.f32 %v63_v28, %v59_v31 }
  0x26   :  { %v69_v37 = vadd.f32 %v68_v32, %v64_v35 }
  0x28   :  { %v74_v39 = vadd.f32 %v73_v36, %v69_v37 }
  0x2a   :  { %v79_v40 = vadd.f32 %v78_v38, %v74_v39 }
  0x2c   :  { %80 = vst [vmem:[%s173_s3] sm:$0x1] %v79_v40 }
  0x2d   :  { %85 = vsyncpa [#allocation4], 1 }

</bundles_post_ra>
